<compile_context>
chip_gen: v6e
topology: v6e:2x2x1
jax: 0.10.0
libtpu: 0.0.40
codegen_flags: <defaults>
</compile_context>

<pallas_src>
import math
import functools

import jax
import jax.numpy as jnp
from jax import lax
from jax.experimental import pallas as pl
from jax.experimental.pallas import tpu as pltpu

_MASK_VALUE = -1e30  # large finite negative (avoids inf-inf NaN corner cases)


def _pick_tile(S, target):
    """Largest tile <= target that divides S and is a multiple of 8 (or S)."""
    if S <= target:
        return S
    t = target - (target % 8)
    while t >= 8:
        if S % t == 0:
            return t
        t -= 8
    # TODO(synk): pad S to a multiple of 8 for awkward lengths instead of
    # falling back to a full-length tile (can blow VMEM for huge prime S).
    return S


# --------------------------------------------------------------------------
# Kernel 1: fused QKV projection, lane-dense (B, S, D) bf16 outputs.
# --------------------------------------------------------------------------
def _qkv_proj_kernel(x_ref, wq_ref, wk_ref, wv_ref, bq_ref, bk_ref, bv_ref,
                     q_ref, k_ref, v_ref, *, scale):
    """
    x_ref : (1, ts, D) bf16        w*_ref : (D, D) bf16      b*_ref : (1, D) f32
    q/k/v : (1, ts, D) bf16 outputs (q pre-scaled by 1/sqrt(d_head))
    """
    x = x_ref[0]                                                   # (ts, D)
    q = jnp.dot(x, wq_ref[...], preferred_element_type=jnp.float32)
    q_ref[0] = ((q + bq_ref[...]) * scale).astype(q_ref.dtype)
    k = jnp.dot(x, wk_ref[...], preferred_element_type=jnp.float32)
    k_ref[0] = (k + bk_ref[...]).astype(k_ref.dtype)
    v = jnp.dot(x, wv_ref[...], preferred_element_type=jnp.float32)
    v_ref[0] = (v + bv_ref[...]).astype(v_ref.dtype)


# --------------------------------------------------------------------------
# Kernel 2: flash attention (online softmax) + fused output projection.
# --------------------------------------------------------------------------
def _flash_attn_kernel(q_ref, k_ref, v_ref, wo_ref, bo_ref, o_ref,
                       m_s, l_s, acc_s, *,
                       n_heads, d_head, causal, tq, tk, exp_bf16):
    """
    q_ref : (1, tq, D) bf16    k_ref/v_ref : (1, tk, D) bf16
    wo_ref: (D, D) bf16        bo_ref      : (1, D) f32
    o_ref : (1, tq, D) out dtype
    m_s/l_s : VMEM (H, tq, 1) f32     acc_s : VMEM (tq, D) f32 (lane-dense)
    """
    i = pl.program_id(1)
    j = pl.program_id(2)
    H, dh = n_heads, d_head

    @pl.when(j == 0)
    def _init():
        m_s[...] = jnp.full_like(m_s, -jnp.inf)
        l_s[...] = jnp.zeros_like(l_s)
        acc_s[...] = jnp.zeros_like(acc_s)

    def _update():
        q_all = q_ref[0]                  # (tq, D) bf16, pre-scaled
        k_all = k_ref[0]                  # (tk, D) bf16
        v_all = v_ref[0]                  # (tk, D) bf16

        if causal:
            # Additive bias built once per tile (shared across all heads).
            row = i * tq + lax.broadcasted_iota(jnp.int32, (tq, tk), 0)
            col = j * tk + lax.broadcasted_iota(jnp.int32, (tq, tk), 1)
            bias = jnp.where(col > row, jnp.float32(_MASK_VALUE),
                             jnp.float32(0.0))
        else:
            bias = None

        # Static unroll over heads: QK^T has full MXU output width (N = tk);
        # softmax bookkeeping stays f32; p is bf16 for the PV matmul.
        for h in range(H):
            lo, hi = h * dh, (h + 1) * dh
            q_h = q_all[:, lo:hi]                                  # (tq, dh)
            k_h = k_all[:, lo:hi]                                  # (tk, dh)
            v_h = v_all[:, lo:hi]                                  # (tk, dh)

            s = jnp.einsum('qd,kd->qk', q_h, k_h,
                           preferred_element_type=jnp.float32)     # (tq, tk)
            if causal:
                s = s + bias

            m_prev = m_s[h]                                        # (tq, 1)
            m_new = jnp.maximum(m_prev, jnp.max(s, axis=-1, keepdims=True))
            alpha = jnp.exp(m_prev - m_new)                        # f32

            if exp_bf16:
                # bf16 EUP exp (v6e / v7x only); l-sum accumulated in f32.
                p = jnp.exp((s - m_new).astype(jnp.bfloat16))      # (tq,tk) bf16
                row_sum = jnp.sum(p, axis=-1, keepdims=True,
                                  dtype=jnp.float32)
            else:
                p32 = jnp.exp(s - m_new)                           # f32 (v5e)
                row_sum = jnp.sum(p32, axis=-1, keepdims=True)
                p = p32.astype(jnp.bfloat16)

            l_s[h] = alpha * l_s[h] + row_sum
            acc_s[:, lo:hi] = alpha * acc_s[:, lo:hi] + jnp.dot(
                p, v_h, preferred_element_type=jnp.float32)
            m_s[h] = m_new

    if causal:
        # Skip kv blocks entirely above the diagonal (DMA already clamped
        # in the wrapper's index_map so no extra HBM traffic either).
        @pl.when(j * tk <= i * tq + (tq - 1))
        def _():
            _update()
    else:
        _update()

    @pl.when(j == pl.num_programs(2) - 1)
    def _finalize():
        # Per-head 1/l normalization in place (EUP approx reciprocal), then a
        # single lane-dense (tq, D) @ (D, D) output projection (K = D).
        for h in range(H):
            lo, hi = h * dh, (h + 1) * dh
            inv = pl.reciprocal(l_s[h], approx=True)               # (tq, 1)
            acc_s[:, lo:hi] = acc_s[:, lo:hi] * inv
        attn = acc_s[...].astype(jnp.bfloat16)                     # (tq, D)
        out = jnp.dot(attn, wo_ref[...], preferred_element_type=jnp.float32)
        o_ref[0] = (out + bo_ref[...]).astype(o_ref.dtype)


# --------------------------------------------------------------------------
# Wrapper
# --------------------------------------------------------------------------
def self_attention(x, w_in, b_in, w_out, b_out, n_heads, *, causal_mask=False):
    """x: (B, S, D) float32.  w_in: (D, 3D), b_in: (3D,), w_out: (D, D),
    b_out: (D,) — (in_features, out_features) storage, i.e. y = x @ W + b.
    Returns (B, S, D)."""
    B, S, D = x.shape
    assert D % n_heads == 0
    H = n_heads
    dh = D // H
    scale = 1.0 / math.sqrt(dh)

    # bf16 exp only where the EUP has a bf16 path (v6e / v7x); f32 on v5e and
    # older.  (A wrong guess is still correct, just not faster.)
    kind = jax.devices()[0].device_kind.lower()
    exp_bf16 = not any(v in kind for v in ("v2", "v3", "v4", "v5"))

    # Split fused QKV weight/bias (layout plumbing only — tiny tensors).
    w_q, w_k, w_v = jnp.split(w_in, 3, axis=1)            # each (D, D)
    b_q, b_k, b_v = jnp.split(b_in, 3)                    # each (D,)

    wq, wk, wv = (w.astype(jnp.bfloat16) for w in (w_q, w_k, w_v))
    bq = b_q.reshape(1, D).astype(jnp.float32)
    bk = b_k.reshape(1, D).astype(jnp.float32)
    bv = b_v.reshape(1, D).astype(jnp.float32)
    wo = w_out.astype(jnp.bfloat16)
    bo = b_out.reshape(1, D).astype(jnp.float32)

    x_bf = x.astype(jnp.bfloat16)      # halves kernel-1 input HBM reads
    # TODO(synk): on v5e, folding the q projection into kernel 2 would save one
    # HBM round-trip of q; not done here to keep both kernels simple.

    ts = _pick_tile(S, 256)            # kernel-1 sequence tile
    tq = _pick_tile(S, 256)            # kernel-2 query tile
    tk = _pick_tile(S, 512)            # kernel-2 key/value tile (bigger)
    n_s, n_q, n_kv = S // ts, S // tq, S // tk

    vmem_limit = 64 * 1024 * 1024      # explicit scoped-VMEM budget

    # ---- Kernel 1: QKV projection -> three (B, S, D) bf16 tensors ----
    qkv_shape = jax.ShapeDtypeStruct((B, S, D), jnp.bfloat16)
    q, k, v = pl.pallas_call(
        functools.partial(_qkv_proj_kernel, scale=scale),
        out_shape=(qkv_shape, qkv_shape, qkv_shape),
        grid_spec=pltpu.PrefetchScalarGridSpec(
            num_scalar_prefetch=0,
            grid=(B, n_s),
            in_specs=[
                pl.BlockSpec((1, ts, D), lambda b, s: (b, s, 0)),   # x
                pl.BlockSpec((D, D), lambda b, s: (0, 0)),          # wq
                pl.BlockSpec((D, D), lambda b, s: (0, 0)),          # wk
                pl.BlockSpec((D, D), lambda b, s: (0, 0)),          # wv
                pl.BlockSpec((1, D), lambda b, s: (0, 0)),          # bq
                pl.BlockSpec((1, D), lambda b, s: (0, 0)),          # bk
                pl.BlockSpec((1, D), lambda b, s: (0, 0)),          # bv
            ],
            out_specs=[
                pl.BlockSpec((1, ts, D), lambda b, s: (b, s, 0)),
                pl.BlockSpec((1, ts, D), lambda b, s: (b, s, 0)),
                pl.BlockSpec((1, ts, D), lambda b, s: (b, s, 0)),
            ],
        ),
        compiler_params=pltpu.CompilerParams(
            dimension_semantics=("parallel", "parallel"),
            vmem_limit_bytes=vmem_limit),
    )(x_bf, wq, wk, wv, bq, bk, bv)

    # ---- Kernel 2: flash attention + fused output projection ----
    if causal_mask:
        # Clamp fully-masked kv blocks to the last needed block: unchanged
        # block index between consecutive steps => Pallas skips the re-fetch.
        def kv_map(b, i, j):
            return (b, jnp.minimum(j, (i * tq + tq - 1) // tk), 0)
    else:
        def kv_map(b, i, j):
            return (b, j, 0)

    out = pl.pallas_call(
        functools.partial(_flash_attn_kernel, n_heads=H, d_head=dh,
                          causal=causal_mask, tq=tq, tk=tk, exp_bf16=exp_bf16),
        out_shape=jax.ShapeDtypeStruct((B, S, D), x.dtype),
        grid_spec=pltpu.PrefetchScalarGridSpec(
            num_scalar_prefetch=0,
            grid=(B, n_q, n_kv),
            in_specs=[
                pl.BlockSpec((1, tq, D), lambda b, i, j: (b, i, 0)),  # q
                pl.BlockSpec((1, tk, D), kv_map),                     # k
                pl.BlockSpec((1, tk, D), kv_map),                     # v
                pl.BlockSpec((D, D), lambda b, i, j: (0, 0)),         # w_out
                pl.BlockSpec((1, D), lambda b, i, j: (0, 0)),         # b_out
            ],
            out_specs=pl.BlockSpec((1, tq, D), lambda b, i, j: (b, i, 0)),
            scratch_shapes=[
                pltpu.VMEM((H, tq, 1), jnp.float32),   # running max per head
                pltpu.VMEM((H, tq, 1), jnp.float32),   # running denom per head
                pltpu.VMEM((tq, D), jnp.float32),      # lane-dense accumulator
            ],
        ),
        compiler_params=pltpu.CompilerParams(
            dimension_semantics=("parallel", "parallel", "arbitrary"),
            vmem_limit_bytes=vmem_limit),
    )(q, k, v, wo, bo)
    return out


def self_attention_ref(x, w_in, b_in, w_out, b_out, n_heads, *, causal_mask=False):
    """Pure-JAX f32 reference (mirrors the intended PyTorch forward)."""
    B, S, D = x.shape
    d_head = D // n_heads
    qkv = x @ w_in + b_in                                    # (B, S, 3D)
    q, k, v = jnp.split(qkv, 3, axis=-1)

    def heads(t):  # (B, S, D) -> (B, H, S, dh)
        return t.reshape(B, S, n_heads, d_head).transpose(0, 2, 1, 3)

    q, k, v = heads(q), heads(k), heads(v)
    att = jnp.einsum("bhqd,bhkd->bhqk", q, k) / math.sqrt(d_head)
    if causal_mask:
        mask = jnp.triu(jnp.ones((S, S), dtype=bool), k=1)
        att = jnp.where(mask[None, None], -jnp.inf, att)
    att = jax.nn.softmax(att, axis=-1)
    out = jnp.einsum("bhqk,bhkd->bhqd", att, v)              # (B, H, S, dh)
    out = out.transpose(0, 2, 1, 3).reshape(B, S, D)
    return out @ w_out + b_out


if __name__ == "__main__":
    # Small shapes consistent with the module's forward: (B, S, d_embed)
    B, S, D = 2, 8, 32
    n_heads = 4

    key = jax.random.PRNGKey(0)
    kx, k1, k2, k3, k4 = jax.random.split(key, 5)

    bound_in = 1.0 / math.sqrt(D)
    x = jax.random.normal(kx, (B, S, D), dtype=jnp.float32)
    w_in = jax.random.uniform(k1, (D, 3 * D), jnp.float32, -bound_in, bound_in)
    b_in = jax.random.uniform(k2, (3 * D,), jnp.float32, -bound_in, bound_in)
    w_out = jax.random.uniform(k3, (D, D), jnp.float32, -bound_in, bound_in)
    b_out = jax.random.uniform(k4, (D,), jnp.float32, -bound_in, bound_in)

    out = self_attention(x, w_in, b_in, w_out, b_out, n_heads, causal_mask=False)
    out = jax.block_until_ready(out)
    ref = self_attention_ref(x, w_in, b_in, w_out, b_out, n_heads, causal_mask=False)
    assert out.shape == (B, S, D)
    assert jnp.allclose(out, ref, atol=3e-2, rtol=3e-2), "mismatch vs reference"

    # Causal path.
    out_c = jax.block_until_ready(
        self_attention(x, w_in, b_in, w_out, b_out, n_heads, causal_mask=True))
    ref_c = self_attention_ref(x, w_in, b_in, w_out, b_out, n_heads, causal_mask=True)
    assert jnp.allclose(out_c, ref_c, atol=3e-2, rtol=3e-2), "causal mismatch"

    print("KERNEL_OK")
</pallas_src>

<mosaic_0001>
module attributes {stable_mosaic.version = 11 : i64} {
  func.func @_qkv_proj_kernel(%arg0: i32, %arg1: i32, %arg2: memref<1x8x32xbf16, #tpu.memory_space<vmem>>, %arg3: memref<32x32xbf16, #tpu.memory_space<vmem>>, %arg4: memref<32x32xbf16, #tpu.memory_space<vmem>>, %arg5: memref<32x32xbf16, #tpu.memory_space<vmem>>, %arg6: memref<1x32xf32, #tpu.memory_space<vmem>>, %arg7: memref<1x32xf32, #tpu.memory_space<vmem>>, %arg8: memref<1x32xf32, #tpu.memory_space<vmem>>, %arg9: memref<1x8x32xbf16, #tpu.memory_space<vmem>>, %arg10: memref<1x8x32xbf16, #tpu.memory_space<vmem>>, %arg11: memref<1x8x32xbf16, #tpu.memory_space<vmem>>) attributes {dimension_semantics = [#tpu.dimension_semantics<parallel>, #tpu.dimension_semantics<parallel>], iteration_bounds = array<i64: 2, 1>, scalar_prefetch = 0 : i64, scratch_operands = 0 : i64, tpu.core_type = #tpu.core_type<tc>, window_params = [{transform_indices = @transform_0, window_bounds = array<i64: 1, 8, 32>}, {pipeline_mode = #tpu.pipeline_mode<synchronous>, transform_indices = @transform_1, window_bounds = array<i64: 32, 32>}, {pipeline_mode = #tpu.pipeline_mode<synchronous>, transform_indices = @transform_2, window_bounds = array<i64: 32, 32>}, {pipeline_mode = #tpu.pipeline_mode<synchronous>, transform_indices = @transform_3, window_bounds = array<i64: 32, 32>}, {pipeline_mode = #tpu.pipeline_mode<synchronous>, transform_indices = @transform_4, window_bounds = array<i64: 1, 32>}, {pipeline_mode = #tpu.pipeline_mode<synchronous>, transform_indices = @transform_5, window_bounds = array<i64: 1, 32>}, {pipeline_mode = #tpu.pipeline_mode<synchronous>, transform_indices = @transform_6, window_bounds = array<i64: 1, 32>}, {transform_indices = @transform_7, window_bounds = array<i64: 1, 8, 32>}, {transform_indices = @transform_8, window_bounds = array<i64: 1, 8, 32>}, {transform_indices = @transform_9, window_bounds = array<i64: 1, 8, 32>}]} {
    %c0 = arith.constant 0 : index
    %c0_0 = arith.constant 0 : index
    %c0_1 = arith.constant 0 : index
    %0 = vector.load %arg2[%c0, %c0_0, %c0_1] : memref<1x8x32xbf16, #tpu.memory_space<vmem>>, vector<1x8x32xbf16>
    %1 = vector.shape_cast %0 : vector<1x8x32xbf16> to vector<8x32xbf16>
    %c0_2 = arith.constant 0 : index
    %c0_3 = arith.constant 0 : index
    %2 = vector.load %arg3[%c0_2, %c0_3] : memref<32x32xbf16, #tpu.memory_space<vmem>>, vector<32x32xbf16>
    %cst = arith.constant dense<0.000000e+00> : vector<8x32xf32>
    %3 = tpu.matmul %1, %2, %cst {dimension_numbers = #tpu.dot_dimension_numbers<[1], [0], [0], [1], [0, 0, 1, 1], [], []>} : vector<8x32xbf16>, vector<32x32xbf16>, vector<8x32xf32> -> vector<8x32xf32>
    %c0_4 = arith.constant 0 : index
    %c0_5 = arith.constant 0 : index
    %4 = vector.load %arg6[%c0_4, %c0_5] : memref<1x32xf32, #tpu.memory_space<vmem>>, vector<1x32xf32>
    %5 = vector.broadcast %4 : vector<1x32xf32> to vector<8x32xf32>
    %6 = arith.addf %3, %5 : vector<8x32xf32>
    %cst_6 = arith.constant 0.353553385 : f32
    %7 = vector.broadcast %cst_6 : f32 to vector<8x32xf32>
    %8 = arith.mulf %6, %7 : vector<8x32xf32>
    %9 = arith.truncf %8 : vector<8x32xf32> to vector<8x32xbf16>
    %c0_7 = arith.constant 0 : index
    %c0_8 = arith.constant 0 : index
    %c0_9 = arith.constant 0 : index
    %10 = vector.load %arg9[%c0_7, %c0_8, %c0_9] : memref<1x8x32xbf16, #tpu.memory_space<vmem>>, vector<1x8x32xbf16>
    %11 = vector.shape_cast %10 : vector<1x8x32xbf16> to vector<8x32xbf16>
    %12 = vector.shape_cast %9 : vector<8x32xbf16> to vector<1x8x32xbf16>
    tpu.vector_store %arg9[%c0_7, %c0_8, %c0_9], %12 {strides = array<i32>} : memref<1x8x32xbf16, #tpu.memory_space<vmem>>, vector<1x8x32xbf16>,
    %c0_10 = arith.constant 0 : index
    %c0_11 = arith.constant 0 : index
    %13 = vector.load %arg4[%c0_10, %c0_11] : memref<32x32xbf16, #tpu.memory_space<vmem>>, vector<32x32xbf16>
    %cst_12 = arith.constant dense<0.000000e+00> : vector<8x32xf32>
    %14 = tpu.matmul %1, %13, %cst_12 {dimension_numbers = #tpu.dot_dimension_numbers<[1], [0], [0], [1], [0, 0, 1, 1], [], []>} : vector<8x32xbf16>, vector<32x32xbf16>, vector<8x32xf32> -> vector<8x32xf32>
    %c0_13 = arith.constant 0 : index
    %c0_14 = arith.constant 0 : index
    %15 = vector.load %arg7[%c0_13, %c0_14] : memref<1x32xf32, #tpu.memory_space<vmem>>, vector<1x32xf32>
    %16 = vector.broadcast %15 : vector<1x32xf32> to vector<8x32xf32>
    %17 = arith.addf %14, %16 : vector<8x32xf32>
    %18 = arith.truncf %17 : vector<8x32xf32> to vector<8x32xbf16>
    %c0_15 = arith.constant 0 : index
    %c0_16 = arith.constant 0 : index
    %c0_17 = arith.constant 0 : index
    %19 = vector.load %arg10[%c0_15, %c0_16, %c0_17] : memref<1x8x32xbf16, #tpu.memory_space<vmem>>, vector<1x8x32xbf16>
    %20 = vector.shape_cast %19 : vector<1x8x32xbf16> to vector<8x32xbf16>
    %21 = vector.shape_cast %18 : vector<8x32xbf16> to vector<1x8x32xbf16>
    tpu.vector_store %arg10[%c0_15, %c0_16, %c0_17], %21 {strides = array<i32>} : memref<1x8x32xbf16, #tpu.memory_space<vmem>>, vector<1x8x32xbf16>,
    %c0_18 = arith.constant 0 : index
    %c0_19 = arith.constant 0 : index
    %22 = vector.load %arg5[%c0_18, %c0_19] : memref<32x32xbf16, #tpu.memory_space<vmem>>, vector<32x32xbf16>
    %cst_20 = arith.constant dense<0.000000e+00> : vector<8x32xf32>
    %23 = tpu.matmul %1, %22, %cst_20 {dimension_numbers = #tpu.dot_dimension_numbers<[1], [0], [0], [1], [0, 0, 1, 1], [], []>} : vector<8x32xbf16>, vector<32x32xbf16>, vector<8x32xf32> -> vector<8x32xf32>
    %c0_21 = arith.constant 0 : index
    %c0_22 = arith.constant 0 : index
    %24 = vector.load %arg8[%c0_21, %c0_22] : memref<1x32xf32, #tpu.memory_space<vmem>>, vector<1x32xf32>
    %25 = vector.broadcast %24 : vector<1x32xf32> to vector<8x32xf32>
    %26 = arith.addf %23, %25 : vector<8x32xf32>
    %27 = arith.truncf %26 : vector<8x32xf32> to vector<8x32xbf16>
    %c0_23 = arith.constant 0 : index
    %c0_24 = arith.constant 0 : index
    %c0_25 = arith.constant 0 : index
    %28 = vector.load %arg11[%c0_23, %c0_24, %c0_25] : memref<1x8x32xbf16, #tpu.memory_space<vmem>>, vector<1x8x32xbf16>
    %29 = vector.shape_cast %28 : vector<1x8x32xbf16> to vector<8x32xbf16>
    %30 = vector.shape_cast %27 : vector<8x32xbf16> to vector<1x8x32xbf16>
    tpu.vector_store %arg11[%c0_23, %c0_24, %c0_25], %30 {strides = array<i32>} : memref<1x8x32xbf16, #tpu.memory_space<vmem>>, vector<1x8x32xbf16>,
    return
  }
  func.func @transform_0(%arg0: i32, %arg1: i32) -> (i32, i32, i32) {
    %c0_i32 = arith.constant 0 : i32
    %c0_i32_0 = arith.constant 0 : i32
    return %arg0, %arg1, %c0_i32 : i32, i32, i32
  }
  func.func @transform_1(%arg0: i32, %arg1: i32) -> (i32, i32) {
    %c0_i32 = arith.constant 0 : i32
    %c0_i32_0 = arith.constant 0 : i32
    %c0_i32_1 = arith.constant 0 : i32
    return %c0_i32, %c0_i32_0 : i32, i32
  }
  func.func @transform_2(%arg0: i32, %arg1: i32) -> (i32, i32) {
    %c0_i32 = arith.constant 0 : i32
    %c0_i32_0 = arith.constant 0 : i32
    %c0_i32_1 = arith.constant 0 : i32
    return %c0_i32, %c0_i32_0 : i32, i32
  }
  func.func @transform_3(%arg0: i32, %arg1: i32) -> (i32, i32) {
    %c0_i32 = arith.constant 0 : i32
    %c0_i32_0 = arith.constant 0 : i32
    %c0_i32_1 = arith.constant 0 : i32
    return %c0_i32, %c0_i32_0 : i32, i32
  }
  func.func @transform_4(%arg0: i32, %arg1: i32) -> (i32, i32) {
    %c0_i32 = arith.constant 0 : i32
    %c0_i32_0 = arith.constant 0 : i32
    %c0_i32_1 = arith.constant 0 : i32
    return %c0_i32, %c0_i32_0 : i32, i32
  }
  func.func @transform_5(%arg0: i32, %arg1: i32) -> (i32, i32) {
    %c0_i32 = arith.constant 0 : i32
    %c0_i32_0 = arith.constant 0 : i32
    %c0_i32_1 = arith.constant 0 : i32
    return %c0_i32, %c0_i32_0 : i32, i32
  }
  func.func @transform_6(%arg0: i32, %arg1: i32) -> (i32, i32) {
    %c0_i32 = arith.constant 0 : i32
    %c0_i32_0 = arith.constant 0 : i32
    %c0_i32_1 = arith.constant 0 : i32
    return %c0_i32, %c0_i32_0 : i32, i32
  }
  func.func @transform_7(%arg0: i32, %arg1: i32) -> (i32, i32, i32) {
    %c0_i32 = arith.constant 0 : i32
    %c0_i32_0 = arith.constant 0 : i32
    return %arg0, %arg1, %c0_i32 : i32, i32, i32
  }
  func.func @transform_8(%arg0: i32, %arg1: i32) -> (i32, i32, i32) {
    %c0_i32 = arith.constant 0 : i32
    %c0_i32_0 = arith.constant 0 : i32
    return %arg0, %arg1, %c0_i32 : i32, i32, i32
  }
  func.func @transform_9(%arg0: i32, %arg1: i32) -> (i32, i32, i32) {
    %c0_i32 = arith.constant 0 : i32
    %c0_i32_0 = arith.constant 0 : i32
    return %arg0, %arg1, %c0_i32 : i32, i32, i32
  }
}

</mosaic_0001>

<bundles_post_ra>
// kernel: tpu_custom_call.1
= control target key start
LH: loop header
LB: loop body
LE: loop exit
PB: predicated region body
PF: predicated region fallthrough
CT: control target
= control target key end

     0   :  { %s1643_s0 = inlined_call_operand.hbm [shape: bf16[2,8,32], index: 0, kind: input, shape index: {}]   ;;  %s1644_s1 = inlined_call_operand.hbm [shape: bf16[32,32], index: 1, kind: input, shape index: {}]   ;;  %s1645_s2 = inlined_call_operand.hbm [shape: bf16[32,32], index: 2, kind: input, shape index: {}]   ;;  %s1646_s3 = inlined_call_operand.hbm [shape: bf16[32,32], index: 3, kind: input, shape index: {}]   ;;  %s1647_s4 = inlined_call_operand.vmem [shape: f32[1,32], index: 4, kind: input, shape index: {}]   ;;  %s1648_s5 = inlined_call_operand.vmem [shape: f32[1,32], index: 5, kind: input, shape index: {}]   ;;  %s1649_s6 = inlined_call_operand.vmem [shape: f32[1,32], index: 6, kind: input, shape index: {}]   ;;  %s1650_s7 = inlined_call_operand.hbm [shape: bf16[2,8,32], index: 7, kind: output, shape index: {0}]   ;;  %s1651_s8 = inlined_call_operand.hbm [shape: bf16[2,8,32], index: 8, kind: output, shape index: {1}]   ;;  %s1652_s9 = inlined_call_operand.hbm [shape: bf16[2,8,32], index: 9, kind: output, shape index: {2}]  }
   0x1   :  { %1660 = sst [smem:[#allocation21_spill]] %s1643_s0 }
   0x2   :  { %1661 = sst [smem:[#allocation22_spill]] %s1644_s1 }
   0x3   :  { %1662 = sst [smem:[#allocation23_spill]] %s1645_s2 }
   0x4   :  { %1663 = sst [smem:[#allocation24_spill]] %s1646_s3 }
   0x5   :  { %15 = vsyncpa [#allocation3], 0 }
   0x6   :  { %17 = vsyncpa [#allocation3 + $0x1], 0 }
   0x7   :  { %18 = vsyncpa [#allocation6], 0 }
   0x8   :  { %19 = vsyncpa [#allocation9], 0 }
   0x9   :  { %20 = vsyncpa [#allocation4], 0 }
   0xa   :  { %22 = vsyncpa [#allocation4 + $0x1], 0 }
   0xb   :  { %23 = vsyncpa [#allocation12], 0 }
   0xc   :  { %25 = vsyncpa [#allocation12 + $0x1], 0  ;;  %s1355_s30 = smov 0   ;;  %s1357_s10 = smov 0  }
   0xd   :  { %s1359_s11 = smov 0   ;;  %s1361_s12 = smov 0  }
   0xe   :  { %s1363_s13 = smov 0   ;;  %s1365_s14 = smov 0  }
   0xf LB: > { %s1386_s15 = sadd.s32 4294967295, %s1292_s14   ;;  %s1654_s16 = sadd.s32 4294967294, %s1292_s14   ;;  %s1292_s14 = sphi %s1365_s14, %s31_s14   ;;  %s1288_s13 = sphi %s1363_s13, %s1693_s13   ;;  %s1284_s12 = sphi %s1361_s12, %s1692_s12   ;;  %s1280_s11 = sphi %s1359_s11, %s1691_s11   ;;  %s1276_s10 = sphi %s1357_s10, %s1690_s10   ;;  %s1272_s30 = sphi %s1355_s30, %s1689_s30  }
  0x10   : > { %p65_p0 = scmp.ne.s32.totalorder %s1276_s10, %s1272_s30  ;;  %p1653_p1 = scmp.eq.s32.totalorder %s1386_s15, 0 }
  0x11   : > { %p223_p3 = scmp.eq.s32.totalorder %s1654_s16, 1  ;;  %p861_p5 = scmp.ge.s32.totalorder %s1292_s14, 1 }
  0x12   : > { %p1397_p4 = por %p1653_p1, %p65_p0  ;;  %p286_p7 = scmp.lt.s32.totalorder %s1292_s14, 3 }
  0x13   : > { %p1402_p6 = por %p223_p3, %p65_p0  ;;  %s1294_s20 = smov [#allocation5]  }
  0x14   : > { %s1664_s17 = scalar_select %p1397_p4, 1, 0 }
  0x15   : > { %s1665_s18 = scalar_select %p1402_p6, 1, 0 }
  0x16   : > { %p1407_p8 = pnand %p861_p5, %p286_p7  ;;  %s298_s21 = sshll.u32 %s1294_s20, 4  ;;  %s299_s21 = int_to_ptr.vmem [resolvable:$true] %s298_s21 }
  0x17   : > { %1666 = sst [smem:[#allocation19_spill]] %s1665_s18  ;;  %s1295_s23 = smov [#allocation7]  }
  0x18   : > { %p949_p9 = pneg %p1407_p8  ;;  %s311_s24 = sshll.u32 %s1295_s23, 4  ;;  %s312_s24 = int_to_ptr.vmem [resolvable:$true] %s311_s24 }
  0x19   : > { %s1296_s25 = smov [#allocation8]   ;;  %s1053_s27 = scalar_lea.vmem %s299_s21, 256 }
  0x1a   : > { %p1416_p11 = pnand %p949_p9, %p1653_p1  ;;  %s324_s26 = sshll.u32 %s1296_s25, 4  ;;  %s325_s26 = int_to_ptr.vmem [resolvable:$true] %s324_s26 }
  0x1b   : > { %p1054_p13 = scmp.ne.s32.totalorder %s299_s21, %s1053_s27  ;;  %p1061_p5 = scmp.lt.s32.totalorder %s299_s21, %s299_s21 }
  0x1c   : > { %p1044_p12 = pneg %p1416_p11  ;;  %p1062_p7 = scmp.lt.s32.totalorder %s1053_s27, %s1053_s27 }
  0x1e   : > { %p1056_p0 = pnand %p1054_p13, %p1044_p12  ;;  %p1063_p9 = por %p1062_p7, %p1061_p5 }
  0x20   : > { %p1057_p3 = pneg %p1056_p0 }
  0x22   : > { %p1064_p10 = pnand %p1063_p9, %p1057_p3 }
  0x24   : > { %1067 = shalt.err (!%p1064_p10)
}
  0x25   : > { %s1297_s28 = smov 64   ;;  %s1298_s29 = smov 4  }
  0x26   : > { %s1669_s1 = sld [smem:[#allocation22_spill]]  ;;  %s1079_s25 = scalar_lea.vmem %s312_s24, 256 }
  0x27   : > { %p1080_p1 = scmp.ne.s32.totalorder %s312_s24, %s1079_s25  ;;  %p1087_p2 = scmp.lt.s32.totalorder %s312_s24, %s312_s24 }
  0x28   : > { %p1088_p6 = scmp.lt.s32.totalorder %s1079_s25, %s1079_s25 }
  0x29   : > { %p1082_p13 = pnand %p1080_p1, %p1044_p12 }
  0x2a   : > { %p1089_p5 = por %p1088_p6, %p1087_p2 }
  0x2b   : > { %p1083_p0 = pneg %p1082_p13 }
  0x2c   : > { %952 = dma.hbm_to_vmem [thread:$0]  (!%p1416_p11), %s1669_s1, 256, %s299_s21, [#allocation6], %s1297_s28, %s1297_s28, %s1298_s29  }
  0x2d   : > { %p1090_p3 = pnand %p1089_p5, %p1083_p0 }
  0x2f   : > { %1093 = shalt.err (!%p1090_p3)
}
  0x30   : > { %s1670_s2 = sld [smem:[#allocation23_spill]]  ;;  %s1105_s21 = scalar_lea.vmem %s325_s26, 256 }
  0x31   : > { %p1106_p10 = scmp.ne.s32.totalorder %s325_s26, %s1105_s21  ;;  %p1113_p9 = scmp.lt.s32.totalorder %s325_s26, %s325_s26 }
  0x32   : > { %p1114_p13 = scmp.lt.s32.totalorder %s1105_s21, %s1105_s21 }
  0x33   : > { %p1108_p7 = pnand %p1106_p10, %p1044_p12 }
  0x34   : > { %p1115_p4 = por %p1114_p13, %p1113_p9 }
  0x35   : > { %p1109_p1 = pneg %p1108_p7 }
  0x36   : > { %955 = dma.hbm_to_vmem [thread:$0]  (!%p1416_p11), %s1670_s2, 256, %s312_s24, [#allocation6], %s1297_s28, %s1297_s28, %s1298_s29  }
  0x37   : > { %p1116_p2 = pnand %p1115_p4, %p1109_p1 }
  0x39   : > { %1119 = shalt.err (!%p1116_p2)
}
  0x3a   : > { %s1671_s3 = sld [smem:[#allocation24_spill]]  ;;  %s52_s16 = sadd.s32 1, %s1280_s11 }
  0x3b   : > { %s43_s24 = sadd.s32 1, %s1288_s13  ;;  %p59_p4 = scmp.ne.s32.totalorder %s1280_s11, %s1276_s10 }
  0x3c   : > { %p45_p6 = scmp.ge.s32.totalorder %s43_s24, 2  ;;  %p60_p12 = scmp.eq.s32.totalorder %s1292_s14, 0 }
  0x3d   : > { %p1672_p0 = scmp.eq.s32.totalorder %s1386_s15, 1  ;;  %p976_p3 = scmp.lt.s32.totalorder %s1292_s14, 2 }
  0x3e   : > { %s1695_s24 = smov (%p45_p6, %s43_s24), 0  ;;  %p61_p10 = por %p60_p12, %p59_p4 }
  0x3f   : > { %p1453_p5 = por %p1672_p0, %p59_p4  ;;  %1674 = sst [smem:[#allocation20_spill]] %s1695_s24 }
  0x40   : > { %958 = dma.hbm_to_vmem [thread:$0]  (!%p1416_p11), %s1671_s3, 256, %s325_s26, [#allocation9], %s1297_s28, %s1297_s28, %s1298_s29  }
  0x41   : > { %s347_s25 = sand.u32 1, %s1280_s11   ;;  %s47_s27 = ssub.s32 %s1288_s13, %s1695_s24 }
  0x42   : > { %p50_p7 = scmp.eq.s32.totalorder %s47_s27, 0  ;;  %s866_s26 = sshll.u32 %s347_s25, 2 }
  0x43   : > { %s867_s28 = sshll.u32 %s1288_s13, 6  ;;  %s1675_s0 = sld [smem:[#allocation21_spill]] }
  0x44   : > { %s1465_s29 = scalar_select %p50_p7, %s1280_s11, %s52_s16  }
  0x45   : > { %s351_s1 = scalar_lea.vmem [#allocation2], %s866_s26  ;;  %p1472_p11 = pnand %p976_p3, %p61_p10 }
  0x46   : > { %s359_s2 = sshll.u32 %s351_s1, 4  ;;  %s348_s18 = scalar_lea.sflag [#allocation3], %s347_s25  ;;  %s360_s2 = int_to_ptr.vmem [resolvable:$true] %s359_s2 }
  0x47   : > { %p1122_p1 = pneg %p1472_p11  ;;  %s1133_s27 = scalar_lea.vmem %s360_s2, 64 }
  0x48   : > { %p1134_p9 = scmp.ne.s32.totalorder %s360_s2, %s1133_s27  ;;  %s1299_s16 = smov [#allocation2]  }
  0x49   : > { %s357_s23 = scalar_lea.hbm %s1675_s0, %s867_s28  ;;  %s1138_s24 = sshll.u32 %s1299_s16, 4  ;;  %s1139_s24 = int_to_ptr.vmem [resolvable:$false] %s1138_s24 }
  0x4a   : > { %p1136_p13 = pnand %p1134_p9, %p1122_p1  ;;  %s1140_s28 = scalar_lea.vmem %s1139_s24, 128 }
  0x4b   : > { %p1141_p4 = scmp.lt.s32.totalorder %s360_s2, %s1139_s24  ;;  %p1142_p6 = scmp.lt.s32.totalorder %s1140_s28, %s1133_s27 }
  0x4c   : > { %p1137_p2 = pneg %p1136_p13 }
  0x4d   : > { %p1143_p12 = por %p1142_p6, %p1141_p4 }
  0x4f   : > { %p1144_p0 = pnand %p1143_p12, %p1137_p2 }
  0x51   : > { %1147 = shalt.err (!%p1144_p0)
}
  0x52   : > { %962 = dma.hbm_to_vmem [thread:$0]  (!%p1472_p11), %s357_s23, 64, %s360_s2, %s348_s18  }
  0x53   : > { %368 = sbr.rel (%p1407_p8) target bundleno = 361 (0x169), region = 48  ;;  %s1483_s1 = sand.u32 (!%p1407_p8), 1, %s1276_s10  }
  0x54   : > { %s1486_s25 = sshll.u32 (!%p1407_p8), %s1483_s1, 2  ;;  %s371_s24 = scalar_lea.sflag (!%p1407_p8), [#allocation3], %s1483_s1 }
  0x55   : > { %s374_s26 = scalar_lea.vmem (!%p1407_p8), [#allocation2], %s1486_s25  ;;  %p1677_p3 = scmp.ne.s32.totalorder (!%p1407_p8), %s1664_s17, 0 }
  0x58   : > { %1251 = dma.done.wait (%p1677_p3), %s371_s24, 64  }
  0x59   : > { %1253 = vsyncadd (%p1677_p3), %s371_s24, 4294967232  ;;  %p1678_p10 = scmp.eq.s32.totalorder %s1386_s15, 0 }
  0x5b   : > { %1255 = dma.done.wait (%p1678_p10), [#allocation6], 512   ;;  %p1679_p8 = pmov %p1678_p10 }
  0x5d   : > { %1257 = vsyncadd (%p1679_p8), [#allocation6], 4294966784  ;;  %p1680_p7 = pmov %p1679_p8 }
  0x5f   : > { %1259 = dma.done.wait (%p1680_p7), [#allocation9], 256   ;;  %p1681_p11 = pmov %p1680_p7 }
  0x60   : > { %v1300_v0 = vmov 0.0   ;;  %vm1301_vm0 = vmmov 0   ;;  %v1036_v1 = vld [vmem:[#allocation5 + $0x8] sm:$0xff]   ;;  %v1037_v2 = vld [vmem:[#allocation7 + $0x8] sm:$0xff]   ;;  %v1038_v3 = vld [vmem:[#allocation5] sm:$0xff]   ;;  %vm456_vm1 = vcmask 261120  }
  0x61   : > { %1261 = vsyncadd (%p1681_p11), [#allocation9], 4294967040  ;;  %905 = vmatprep.subr.bf16.mxu0 %v1300_v0  ;;  %913 = vmatprep.subr.bf16.mxu1 %v1300_v0  ;;  %v1039_v4 = vld [vmem:[#allocation7] sm:$0xff]   ;;  %v432_v5 = vld [vmem:[%s374_s26] sm:$0xf]  ;;  %s639_s19 = sand.u32 1, %s1386_s15  }
  0x62   : > { %909 = vmatprep.mubr.msk.bf16.mxu0 %vm1301_vm0, %v1300_v0  ;;  %917 = vmatprep.mubr.msk.bf16.mxu1 %vm1301_vm0, %v1300_v0  ;;  %v1040_v6 = vld [vmem:[#allocation8 + $0x8] sm:$0xff]   ;;  %v1041_v7 = vld [vmem:[#allocation8] sm:$0xff]   ;;  %v876_v8 = vld [vmem:[%s1647_s4] ss:$0 sm:$0xff]  ;;  %s1513_s21 = sshll.u32 %s1284_s12, 6  ;;  %s423_s20 = scalar_lea.vmem [#allocation11], %s1486_s25 }
  0x63   : > { %906 = vmatpush3.bf16.msra.mxu0 %v1036_v1  ;;  %914 = vmatpush3.bf16.msra.mxu1 %v1037_v2  ;;  %v880_v9 = vld [vmem:[%s1648_s5] ss:$0 sm:$0xff]  ;;  %s673_s23 = sshll.u32 %s423_s20, 4  ;;  %s1658_s27 = scalar_lea.vmem [#allocation10], %s1486_s25  ;;  %vm502_vm2 = vcmask 257024   ;;  %s1525_s23 = int_to_ptr.vmem [resolvable:$true] %s673_s23 }
  0x64   : > { %907 = vmatprep.subr.bf16.mxu0 %v1300_v0  ;;  %915 = vmatprep.subr.bf16.mxu1 %v1300_v0  ;;  %s659_s16 = sshll.u32 %s1658_s27, 4  ;;  %s1523_s12 = scalar_lea.hbm %s1651_s8, %s1513_s21  ;;  %v884_v22 = vld [vmem:[%s1649_s6] ss:$0 sm:$0xff]  ;;  %s1533_s16 = int_to_ptr.vmem [resolvable:$true] %s659_s16 }
  0x65   : > { %s1531_s2 = scalar_lea.hbm %s1650_s7, %s1513_s21  ;;  %s1659_s18 = scalar_lea.vmem [#allocation13], %s1486_s25 }
  0x66   : > { %s1542_s28 = sshll.u32 %s1659_s18, 4  ;;  %s1544_s15 = scalar_lea.sflag [#allocation12], %s639_s19  ;;  %s688_s28 = int_to_ptr.vmem [resolvable:$true] %s1542_s28 }
  0x67   : > { %908 = vmatpush3.bf16.msra.mxu0 %v1038_v3  ;;  %916 = vmatpush3.bf16.msra.mxu1 %v1039_v4  ;;  %s1148_s24 = scalar_lea.vmem %s1525_s23, 64  ;;  %s1302_s26 = smov [#allocation11]  }
  0x68   : > { %921 = vmatprep.subr.bf16.mxu0 %v1300_v0  ;;  %p1149_p1 = scmp.ne.s32.totalorder %s1525_s23, %s1148_s24  ;;  %s1152_s27 = sshll.u32 %s1302_s26, 4  ;;  %s1153_s27 = int_to_ptr.vmem [resolvable:$false] %s1152_s27 }
  0x69   : > { %s1154_s0 = scalar_lea.vmem %s1153_s27, 128  ;;  %p1155_p2 = scmp.lt.s32.totalorder %s1525_s23, %s1153_s27 }
  0x6a   : > { %910 = vmatmul.mubr.msk.bf16.vlgmr.msra.gmra.mxu0 %vm456_vm1, %v432_v5  ;;  %918 = vmatmul.mubr.msk.bf16.vlgmr.msra.gmra.mxu1 %vm456_vm1, %v432_v5  ;;  %p1150_p9 = pnand %p1149_p1, %p1453_p5  ;;  %p1156_p4 = scmp.lt.s32.totalorder %s1154_s0, %s1148_s24 }
  0x6b   : > { %922 = vmatpush3.bf16.msra.mxu0 %v1040_v6  ;;  %925 = vmatprep.mubr.msk.bf16.mxu0 %vm1301_vm0, %v1300_v0 }
  0x6c   : > { %923 = vmatprep.subr.bf16.mxu0 %v1300_v0  ;;  %p1151_p13 = pneg %p1150_p9  ;;  %p1157_p6 = por %p1156_p4, %p1155_p2 }
  0x6e   : > { %p1158_p12 = pnand %p1157_p6, %p1151_p13 }
  0x6f   : > { %924 = vmatpush3.bf16.msra.mxu0 %v1041_v7 }
  0x72   : > { %926 = vmatmul.mubr.msk.bf16.vlgmr.msra.gmra.mxu0 %vm456_vm1, %v432_v5 }
 0x12a   : > { %v494_v10 = vpop.f32.mrf.mxu0  ;;  %v561_v12 = vpop.f32.mrf.mxu1 }
 0x12b   : > { %v495_v11 = vadd.f32 %v876_v8, %v494_v10  ;;  %v562_v14 = vadd.f32 %v880_v9, %v561_v12 }
 0x12c   : > { %v911_v13 = vpop.f32.mrf.mxu0  ;;  %v919_v16 = vpop.f32.mrf.mxu1 }
 0x12d   : > { %v500_v15 = vmul.f32 0.35355338, %v495_v11  ;;  %v567_v17 = vpack.c.bf16 %v562_v14, %v562_v14 }
 0x12e   : > { %v497_v18 = vpop.f32.mrf.mxu0  ;;  %v564_v20 = vpop.f32.mrf.mxu1 }
 0x12f   : > { %v501_v19 = vpack.c.bf16 %v500_v15, %v500_v15  ;;  %568 = vst.msk [vmem:[%s423_s20] sm:$0xf] %vm502_vm2, %v567_v17 }
 0x130   : > { %v912_v21 = vpop.f32.mrf.mxu0  ;;  %v920_v23 = vpop.f32.mrf.mxu1 }
 0x131   : > { %1161 = shalt.err (!%p1158_p12)
}
 0x132   : > { %s1162_s19 = scalar_lea.hbm %s1523_s12, 64  ;;  %s1166_s17 = scalar_lea.hbm %s1651_s8, 128 }
 0x133   : > { %p1163_p0 = scmp.ne.s32.totalorder %s1523_s12, %s1162_s19  ;;  %p1167_p8 = scmp.lt.s32.totalorder %s1523_s12, %s1651_s8 }
 0x134   : > { %p1168_p7 = scmp.lt.s32.totalorder %s1166_s17, %s1162_s19 }
 0x135   : > { %p1164_p3 = pnand %p1163_p0, %p1453_p5 }
 0x136   : > { %p1169_p11 = por %p1168_p7, %p1167_p8 }
 0x137   : > { %p1165_p10 = pneg %p1164_p3 }
 0x139   : > { %p1170_p1 = pnand %p1169_p11, %p1165_p10 }
 0x13b   : > { %1173 = shalt.err (!%p1170_p1)
}
 0x13c   : > { %944 = dma.vmem_to_hbm [thread:$0]  (%p1453_p5), %s1525_s23, 64, %s1523_s12, %s1544_s15   ;;  %v626_v24 = vpop.f32.mrf.mxu0 }
 0x13d   : > { %s1682_s0 = scalar_lea.vmem [#allocation10], %s1486_s25  ;;  %s635_s27 = scalar_lea.sflag [#allocation4], %s1483_s1 }
 0x13e   : > { %503 = vst.msk [vmem:[%s1682_s0] sm:$0xf] %vm502_vm2, %v501_v19  ;;  %s1174_s18 = scalar_lea.vmem %s1533_s16, 64  ;;  %s1303_s24 = smov [#allocation10]  }
 0x13f   : > { %p1175_p9 = scmp.ne.s32.totalorder %s1533_s16, %s1174_s18  ;;  %s1178_s19 = sshll.u32 %s1303_s24, 4  ;;  %s1179_s19 = int_to_ptr.vmem [resolvable:$false] %s1178_s19 }
 0x140   : > { %s1180_s20 = scalar_lea.vmem %s1179_s19, 128  ;;  %p1181_p4 = scmp.lt.s32.totalorder %s1533_s16, %s1179_s19 }
 0x141   : > { %p1176_p13 = pnand %p1175_p9, %p1453_p5  ;;  %p1182_p6 = scmp.lt.s32.totalorder %s1180_s20, %s1174_s18 }
 0x143   : > { %p1177_p2 = pneg %p1176_p13  ;;  %p1183_p12 = por %p1182_p6, %p1181_p4 }
 0x145   : > { %p1184_p0 = pnand %p1183_p12, %p1177_p2 }
 0x147   : > { %1187 = shalt.err (!%p1184_p0)
}
 0x148   : > { %s1188_s23 = scalar_lea.hbm %s1531_s2, 64  ;;  %s1192_s3 = scalar_lea.hbm %s1650_s7, 128 }
 0x149   : > { %p1189_p3 = scmp.ne.s32.totalorder %s1531_s2, %s1188_s23  ;;  %p1193_p7 = scmp.lt.s32.totalorder %s1531_s2, %s1650_s7 }
 0x14a   : > { %p1194_p11 = scmp.lt.s32.totalorder %s1192_s3, %s1188_s23 }
 0x14b   : > { %p1190_p10 = pnand %p1189_p3, %p1453_p5 }
 0x14c   : > { %p1195_p1 = por %p1194_p11, %p1193_p7 }
 0x14d   : > { %p1191_p8 = pneg %p1190_p10 }
 0x14f   : > { %p1196_p9 = pnand %p1195_p1, %p1191_p8 }
 0x151   : > { %1199 = shalt.err (!%p1196_p9)
}
 0x152   : > { %943 = dma.vmem_to_hbm [thread:$0]  (%p1453_p5), %s1533_s16, 64, %s1531_s2, %s635_s27   ;;  %v627_v25 = vadd.f32 %v884_v22, %v626_v24  ;;  %v927_v26 = vpop.f32.mrf.mxu0 }
 0x153   : > { %s1595_s24 = scalar_lea.hbm %s1652_s9, %s1513_s21  ;;  %s1683_s19 = scalar_lea.vmem [#allocation13], %s1486_s25 }
 0x154   : > { %v632_v27 = vpack.c.bf16 %v627_v25, %v627_v25  ;;  %v629_v28 = vpop.f32.mrf.mxu0  ;;  %s1200_s20 = scalar_lea.vmem %s688_s28, 64  ;;  %s1304_s16 = smov [#allocation13]  }
 0x155   : > { %p1201_p13 = scmp.ne.s32.totalorder %s688_s28, %s1200_s20  ;;  %s1204_s2 = sshll.u32 %s1304_s16, 4  ;;  %s1205_s2 = int_to_ptr.vmem [resolvable:$false] %s1204_s2 }
 0x156   : > { %633 = vst.msk [vmem:[%s1683_s19] sm:$0xf] %vm502_vm2, %v632_v27  ;;  %v928_v29 = vpop.f32.mrf.mxu0  ;;  %s1206_s27 = scalar_lea.vmem %s1205_s2, 128  ;;  %p1207_p6 = scmp.lt.s32.totalorder %s688_s28, %s1205_s2 }
 0x157   : > { %p1202_p2 = pnand %p1201_p13, %p1453_p5  ;;  %p1208_p12 = scmp.lt.s32.totalorder %s1206_s27, %s1200_s20 }
 0x159   : > { %p1203_p4 = pneg %p1202_p2  ;;  %p1209_p0 = por %p1208_p12, %p1207_p6 }
 0x15b   : > { %p1210_p3 = pnand %p1209_p0, %p1203_p4 }
 0x15d   : > { %1213 = shalt.err (!%p1210_p3)
}
 0x15e   : > { %s1214_s25 = scalar_lea.hbm %s1595_s24, 64  ;;  %s1218_s1 = scalar_lea.hbm %s1652_s9, 128 }
 0x15f   : > { %p1215_p10 = scmp.ne.s32.totalorder %s1595_s24, %s1214_s25  ;;  %p1219_p11 = scmp.lt.s32.totalorder %s1595_s24, %s1652_s9 }
 0x160   : > { %p1220_p1 = scmp.lt.s32.totalorder %s1218_s1, %s1214_s25 }
 0x161   : > { %p1216_p8 = pnand %p1215_p10, %p1453_p5 }
 0x162   : > { %p1221_p9 = por %p1220_p1, %p1219_p11 }
 0x163   : > { %p1217_p7 = pneg %p1216_p8 }
 0x165   : > { %p1222_p13 = pnand %p1221_p9, %p1217_p7 }
 0x167   : > { %1225 = shalt.err (!%p1222_p13)
}
 0x168   : > { %945 = dma.vmem_to_hbm [thread:$0]  (%p1453_p5), %s688_s28, 64, %s1595_s24, %s1544_s15  }
 0x169 PF: > { %s1684_s17 = sld [smem:[#allocation19_spill]]  ;;  %s699_s26 = sand.u32 1, %s1272_s30  }
 0x16a   : > { %p1686_p4 = scmp.ge.s32.totalorder %s1292_s14, 2  ;;  %s700_s0 = scalar_lea.sflag [#allocation4], %s699_s26 }
 0x16f   : > { %p1685_p2 = scmp.ne.s32.totalorder %s1684_s17, 0 }
 0x171   : > { %p964_p6 = pnand %p1686_p4, %p1685_p2 }
 0x173   : > { %p965_p12 = pneg %p964_p6 }
 0x175   : > { %1263 = dma.done.wait (%p965_p12), %s700_s0, 64  }
 0x176   : > { %1265 = vsyncadd (%p965_p12), %s700_s0, 4294967232  ;;  %s1687_s18 = sadd.s32 4294967294, %s1292_s14  }
 0x177   : > { %s708_s19 = sand.u32 1, %s1687_s18  }
 0x178   : > { %s709_s20 = scalar_lea.sflag [#allocation12], %s708_s19 }
 0x179   : > { %1267 = dma.done.wait (%p965_p12), %s709_s20, 128  }
 0x17a   : > { %1269 = vsyncadd (%p965_p12), %s709_s20, 4294967168  ;;  %s31_s14 = sadd.s32 1, %s1292_s14   ;;  %s1688_s22 = sld [smem:[#allocation20_spill]] }
 0x17b   : > { %p28_p5 = scmp.ge.s32.totalorder %s31_s14, 4   ;;  %s1689_s30 = smov %s1276_s10 }
 0x17c   : > { %s1690_s10 = smov %s1280_s11  ;;  %s1691_s11 = smov %s1465_s29 }
 0x17d   : > { %s1692_s12 = smov %s1288_s13  ;;  %30 = sbr.rel (!%p28_p5) target bundleno = 15 (0xf), region = 137 }
 0x180   : > { %s1693_s13 = smov %s1688_s22 }
 0x182   :  { %723 = vsyncpa [#allocation3], 1 }
 0x183   :  { %725 = vsyncpa [#allocation3 + $0x1], 1 }
 0x184   :  { %726 = vsyncpa [#allocation6], 1 }
 0x185   :  { %727 = vsyncpa [#allocation9], 1 }
 0x186   :  { %728 = vsyncpa [#allocation4], 1 }
 0x187   :  { %730 = vsyncpa [#allocation4 + $0x1], 1 }
 0x188   :  { %731 = vsyncpa [#allocation12], 1 }
 0x189   :  { %733 = vsyncpa [#allocation12 + $0x1], 1 }

</bundles_post_ra>
